<compile_context>
chip_gen: v7x
topology: tpu7x:2x2x1
jax: 0.10.0
libtpu: 0.0.40
codegen_flags: <defaults>
</compile_context>

<pallas_src>
import jax
import jax.numpy as jnp
from jax.experimental import pallas as pl
from jax.experimental.pallas import tpu as pltpu


# ----------------------------------------------------------------------------
# Kernels
# ----------------------------------------------------------------------------
def _make_folded_kernel(H, k):
    """Lane-dense kernel for H | 128.  k = 128 // H tokens share one lane row.

    Block shapes seen by the kernel:
      x_ref     : (TB, R, k*H)  native dtype, token t = r*k + j -> lanes [j*H, (j+1)*H)
      nmask_ref : (k, TB, R)    f32 additive mask (0 valid / -inf padding)
      wt_ref    : (1, k*H)      f32 weight tiled k times (resident across steps)
      b_ref     : (1,)          f32 bias in SMEM
      alpha_ref : (k, TB, R)    f32 output (part-major; wrapper un-permutes)
    """

    def kernel(x_ref, nmask_ref, wt_ref, b_ref, alpha_ref):
        # Full-lane-occupancy VALU pass: cast + multiply on dense 128-lane rows,
        # products and accumulation stay in f32 (accuracy-preserving).
        prod = x_ref[...].astype(jnp.float32) * wt_ref[0]      # (TB, R, k*H)
        b = b_ref[0]

        parts = []                                             # per-token scores
        for j in range(k):                                     # static unroll, k <= 4 typ.
            s = jnp.sum(prod[:, :, j * H:(j + 1) * H], axis=-1)  # (TB, R) f32
            parts.append(s + b + nmask_ref[j])

        # Softmax over the full length axis (= jointly over (j, r)) per batch row.
        m = parts[0].max(axis=-1, keepdims=True)               # (TB, 1)
        for p in parts[1:]:
            m = jnp.maximum(m, p.max(axis=-1, keepdims=True))
        es = [jnp.exp(p - m) for p in parts]                   # EUP
        denom = es[0].sum(axis=-1, keepdims=True)
        for e in es[1:]:
            denom = denom + e.sum(axis=-1, keepdims=True)
        inv = pl.reciprocal(denom, approx=True)                # EUP slot
        inv = inv * (2.0 - denom * inv)                        # Newton step -> ~f32 exact
        for j in range(k):
            alpha_ref[j] = (es[j] * inv).astype(alpha_ref.dtype)

    return kernel


def _general_kernel(x_ref, nmask_ref, w_ref, b_ref, alpha_ref):
    """Fallback for arbitrary H (lane-dense already when H >= 128)."""
    prod = x_ref[...].astype(jnp.float32) * w_ref[0]           # (TB, L, H) f32
    scores = jnp.sum(prod, axis=-1) + b_ref[0] + nmask_ref[...]  # (TB, L)
    m = jnp.max(scores, axis=-1, keepdims=True)
    e = jnp.exp(scores - m)
    s = jnp.sum(e, axis=-1, keepdims=True)
    inv = pl.reciprocal(s, approx=True)
    inv = inv * (2.0 - s * inv)
    alpha_ref[...] = (e * inv).astype(alpha_ref.dtype)


# ----------------------------------------------------------------------------
# Wrapper
# ----------------------------------------------------------------------------
def _default_vmem_limit():
    phys = 64 << 20                       # conservative: v7x per-TC physical VMEM
    try:
        info = pltpu.get_tpu_info()
        phys = int(getattr(info, "vmem_capacity_bytes", phys))
    except Exception:
        pass
    # 3/4 of physical, capped: 96 MiB on v5e/v6e (128 MiB), 48 MiB on v7x (64 MiB).
    return min(int(phys * 3 // 4), 96 << 20)


def _pick_batch_block(batch, row_bytes, target_bytes):
    """Pick the batch tile.

    The tile divides B and is a multiple of 8 (f32 mask/out blocks keep
    (8,128)-aligned second-minor dims) or equals B.  Preferences, in order:
      1. the x tile fits the per-buffer byte budget,
      2. the grid has >= 4 (even) steps -> each v7x TensorCore gets >= 2
         pipelined steps (harmless on v5e/v6e), else at least an even count,
      3. the tile is as large as possible (amortize ~0.35 us/step overhead).
    """
    cands = [c for c in range(8, batch, 8) if batch % c == 0] + [batch]
    fitting = [c for c in cands if c * row_bytes <= target_bytes]
    if not fitting:
        return min(cands)                 # huge rows: smallest aligned tile

    def pref(c):
        steps = batch // c
        return (steps >= 4 and steps % 2 == 0,
                steps >= 2 and steps % 2 == 0,
                c)

    return max(fitting, key=pref)


def linear_self_attn(x, x_mask, weight, bias, *, block_b=None,
                     x_block_bytes=None, vmem_limit_bytes=None):
    """x: [B, L, H] (any float dtype), x_mask: [B, L] bool (True = padding),
    weight: [1, H], bias: [1].  Returns alpha: [B, L] float32."""
    B, L, H = x.shape

    w = weight.reshape(1, H).astype(jnp.float32)          # tiny, loop-invariant
    b = bias.reshape(1).astype(jnp.float32)
    # Additive mask: 0 where valid, -inf where padded (matches masked_fill_(-inf);
    # fully-masked rows yield NaN alpha exactly like the PyTorch module).
    nmask = jnp.where(x_mask, -jnp.inf, 0.0).astype(jnp.float32)  # (B, L)

    if vmem_limit_bytes is None:
        vmem_limit_bytes = _default_vmem_limit()
    if x_block_bytes is None:
        # ~1/8 of the scoped budget per x buffer: 2x double-buffered x blocks
        # + the in-kernel f32 product temp (up to 4x a bf16 block) + the small
        # mask/out blocks stay comfortably under the limit on every generation.
        x_block_bytes = max(1 << 20, vmem_limit_bytes // 8)

    row_bytes = L * H * x.dtype.itemsize
    if block_b is None:
        block_b = _pick_batch_block(B, row_bytes, x_block_bytes)
    assert B % block_b == 0 and (block_b == B or block_b % 8 == 0), block_b
    grid = (B // block_b,)

    cparams = pltpu.CompilerParams(
        dimension_semantics=("parallel",),                 # megacore split on v7x
        vmem_limit_bytes=int(vmem_limit_bytes),
    )
    cost = pl.CostEstimate(
        flops=int(2 * B * L * H + 8 * B * L),
        transcendentals=int(B * L),
        bytes_accessed=int(B * L * H * x.dtype.itemsize + 2 * B * L * 4 + 4 * H + 4),
    )

    k = (128 // H) if (H <= 128 and 128 % H == 0) else 1
    if k > 1 and L % k == 0:
        # ------------------ folded, lane-dense path (H < 128, H | 128) -------
        R = L // k
        x_in = x.reshape(B, R, k * H)                      # free row-major view
        nmask_p = nmask.reshape(B, R, k).transpose(2, 0, 1)  # (k, B, R), tiny
        w_t = jnp.tile(w[0], k).reshape(1, k * H)          # (1, 128)

        out = pl.pallas_call(
            _make_folded_kernel(H, k),
            out_shape=jax.ShapeDtypeStruct((k, B, R), jnp.float32),
            grid=grid,
            in_specs=[
                # x: native dtype, one batch tile per step (auto double-buffered).
                pl.BlockSpec((block_b, R, k * H), lambda i: (i, 0, 0)),
                # additive mask, part-major so the kernel only indexes the lead axis.
                pl.BlockSpec((k, block_b, R), lambda i: (0, i, 0)),
                # tiled weight: constant block index -> DMAed once, stays resident.
                pl.BlockSpec((1, k * H), lambda i: (0, 0)),
                # bias: loop-invariant scalar in SMEM.
                pl.BlockSpec(memory_space=pltpu.MemorySpace.SMEM),
            ],
            out_specs=pl.BlockSpec((k, block_b, R), lambda i: (0, i, 0)),
            compiler_params=cparams,
            cost_estimate=cost,
        )(x_in, nmask_p, w_t, b)
        # Un-permute the tiny (k, B, R) result back to (B, L).
        return out.transpose(1, 2, 0).reshape(B, L)

    # ---------------------- general path (any H) -----------------------------
    return pl.pallas_call(
        _general_kernel,
        out_shape=jax.ShapeDtypeStruct((B, L), jnp.float32),
        grid=grid,
        in_specs=[
            pl.BlockSpec((block_b, L, H), lambda i: (i, 0, 0)),
            pl.BlockSpec((block_b, L), lambda i: (i, 0)),
            pl.BlockSpec((1, H), lambda i: (0, 0)),
            pl.BlockSpec(memory_space=pltpu.MemorySpace.SMEM),
        ],
        out_specs=pl.BlockSpec((block_b, L), lambda i: (i, 0)),
        compiler_params=cparams,
        cost_estimate=cost,
    )(x, nmask, w, b)


# ----------------------------------------------------------------------------
# Reference + tests
# ----------------------------------------------------------------------------
def _reference(x, x_mask, weight, bias):
    xf = x.astype(jnp.float32)
    wf = weight.astype(jnp.float32)
    scores = jnp.sum(xf * wf[0], axis=-1) + bias.astype(jnp.float32)[0]
    scores = jnp.where(x_mask, -jnp.inf, scores)
    return jax.nn.softmax(scores, axis=1)


def _make_inputs(keys, B, L, H, dtype):
    x = jax.random.normal(keys[0], (B, L, H), dtype=jnp.float32).astype(dtype)
    x_mask = jax.random.bernoulli(keys[1], p=0.3, shape=(B, L))
    x_mask = x_mask.at[:, 0].set(False)               # >= 1 valid token per row
    bound = 1.0 / (H ** 0.5)                          # nn.Linear default init
    weight = jax.random.uniform(keys[2], (1, H), minval=-bound, maxval=bound,
                                dtype=jnp.float32)
    bias = jax.random.uniform(keys[3], (1,), minval=-bound, maxval=bound,
                              dtype=jnp.float32)
    return x, x_mask, weight, bias


if __name__ == "__main__":
    key = jax.random.PRNGKey(0)
    ks = jax.random.split(key, 12)

    # --- test 1: module-sized f32 input, folded path (H=32 -> k=4) ----------
    x, m, w, b = _make_inputs(ks[0:4], 2, 8, 32, jnp.float32)
    alpha = jax.block_until_ready(linear_self_attn(x, m, w, b))
    ref = _reference(x, m, w, b)
    assert alpha.shape == (2, 8)
    assert jnp.allclose(alpha, ref, atol=1e-4, rtol=1e-4), "test 1 mismatch"
    assert jnp.allclose(jnp.sum(alpha, axis=1), 1.0, atol=1e-4)

    # --- test 2: bf16, folded path (H=64 -> k=2), multi-step pipelined grid --
    x2, m2, w2, b2 = _make_inputs(ks[4:8], 64, 256, 64, jnp.bfloat16)
    alpha2 = jax.block_until_ready(linear_self_attn(x2, m2, w2, b2))
    ref2 = _reference(x2, m2, w2, b2)
    assert alpha2.shape == (64, 256)
    assert jnp.allclose(alpha2, ref2, atol=1e-4, rtol=1e-3), "test 2 mismatch"
    assert jnp.allclose(jnp.sum(alpha2, axis=1), 1.0, atol=1e-4)

    # --- test 3: general-path fallback (H=48 does not divide 128) -----------
    x3, m3, w3, b3 = _make_inputs(ks[8:12], 4, 16, 48, jnp.float32)
    alpha3 = jax.block_until_ready(linear_self_attn(x3, m3, w3, b3))
    ref3 = _reference(x3, m3, w3, b3)
    assert alpha3.shape == (4, 16)
    assert jnp.allclose(alpha3, ref3, atol=1e-4, rtol=1e-4), "test 3 mismatch"
    assert jnp.allclose(jnp.sum(alpha3, axis=1), 1.0, atol=1e-4)

    print("KERNEL_OK")
</pallas_src>

<mosaic_0001>
module attributes {stable_mosaic.version = 11 : i64} {
  func.func @kernel(%arg0: i32, %arg1: memref<2x2x128xf32, #tpu.memory_space<vmem>>, %arg2: memref<4x2x2xf32, #tpu.memory_space<vmem>>, %arg3: memref<1x128xf32, #tpu.memory_space<vmem>>, %arg4: memref<1xf32, #tpu.memory_space<smem>>, %arg5: memref<4x2x2xf32, #tpu.memory_space<vmem>>) attributes {dimension_semantics = [#tpu.dimension_semantics<parallel>], iteration_bounds = array<i64: 1>, scalar_prefetch = 0 : i64, scratch_operands = 0 : i64, tpu.core_type = #tpu.core_type<tc>, window_params = [{transform_indices = @transform_0, window_bounds = array<i64: 2, 2, 128>}, {transform_indices = @transform_1, window_bounds = array<i64: 4, 2, 2>}, {pipeline_mode = #tpu.pipeline_mode<synchronous>, transform_indices = @transform_2, window_bounds = array<i64: 1, 128>}, {transform_indices = @transform_3, window_bounds = array<i64: 1>}, {transform_indices = @transform_4, window_bounds = array<i64: 4, 2, 2>}]} {
    %c0 = arith.constant 0 : index
    %c0_0 = arith.constant 0 : index
    %c0_1 = arith.constant 0 : index
    %0 = vector.load %arg1[%c0, %c0_0, %c0_1] : memref<2x2x128xf32, #tpu.memory_space<vmem>>, vector<2x2x128xf32>
    %c0_2 = arith.constant 0 : index
    %c0_3 = arith.constant 0 : index
    %1 = vector.load %arg3[%c0_2, %c0_3] : memref<1x128xf32, #tpu.memory_space<vmem>>, vector<1x128xf32>
    %2 = vector.shape_cast %1 : vector<1x128xf32> to vector<128xf32>
    %3 = vector.shape_cast %2 : vector<128xf32> to vector<1x1x128xf32>
    %4 = vector.broadcast %3 : vector<1x1x128xf32> to vector<2x2x128xf32>
    %5 = arith.mulf %0, %4 : vector<2x2x128xf32>
    %c0_4 = arith.constant 0 : index
    %6 = memref.load %arg4[%c0_4] : memref<1xf32, #tpu.memory_space<smem>>
    %7 = vector.extract_strided_slice %5 {offsets = [0, 0, 0], sizes = [2, 2, 32], strides = [1, 1, 1]} : vector<2x2x128xf32> to vector<2x2x32xf32>
    %cst = arith.constant dense<0.000000e+00> : vector<2x2xf32>
    %8 = vector.multi_reduction <add>, %7, %cst [2] : vector<2x2x32xf32> to vector<2x2xf32>
    %9 = vector.broadcast %6 : f32 to vector<2x2xf32>
    %10 = arith.addf %8, %9 : vector<2x2xf32>
    %c0_5 = arith.constant 0 : index
    %c0_6 = arith.constant 0 : index
    %c0_7 = arith.constant 0 : index
    %11 = vector.load %arg2[%c0_5, %c0_6, %c0_7] : memref<4x2x2xf32, #tpu.memory_space<vmem>>, vector<1x2x2xf32>
    %12 = vector.shape_cast %11 : vector<1x2x2xf32> to vector<2x2xf32>
    %13 = arith.addf %10, %12 : vector<2x2xf32>
    %14 = vector.extract_strided_slice %5 {offsets = [0, 0, 32], sizes = [2, 2, 32], strides = [1, 1, 1]} : vector<2x2x128xf32> to vector<2x2x32xf32>
    %cst_8 = arith.constant dense<0.000000e+00> : vector<2x2xf32>
    %15 = vector.multi_reduction <add>, %14, %cst_8 [2] : vector<2x2x32xf32> to vector<2x2xf32>
    %16 = vector.broadcast %6 : f32 to vector<2x2xf32>
    %17 = arith.addf %15, %16 : vector<2x2xf32>
    %c1 = arith.constant 1 : index
    %c0_9 = arith.constant 0 : index
    %c0_10 = arith.constant 0 : index
    %18 = vector.load %arg2[%c1, %c0_9, %c0_10] : memref<4x2x2xf32, #tpu.memory_space<vmem>>, vector<1x2x2xf32>
    %19 = vector.shape_cast %18 : vector<1x2x2xf32> to vector<2x2xf32>
    %20 = arith.addf %17, %19 : vector<2x2xf32>
    %21 = vector.extract_strided_slice %5 {offsets = [0, 0, 64], sizes = [2, 2, 32], strides = [1, 1, 1]} : vector<2x2x128xf32> to vector<2x2x32xf32>
    %cst_11 = arith.constant dense<0.000000e+00> : vector<2x2xf32>
    %22 = vector.multi_reduction <add>, %21, %cst_11 [2] : vector<2x2x32xf32> to vector<2x2xf32>
    %23 = vector.broadcast %6 : f32 to vector<2x2xf32>
    %24 = arith.addf %22, %23 : vector<2x2xf32>
    %c2 = arith.constant 2 : index
    %c0_12 = arith.constant 0 : index
    %c0_13 = arith.constant 0 : index
    %25 = vector.load %arg2[%c2, %c0_12, %c0_13] : memref<4x2x2xf32, #tpu.memory_space<vmem>>, vector<1x2x2xf32>
    %26 = vector.shape_cast %25 : vector<1x2x2xf32> to vector<2x2xf32>
    %27 = arith.addf %24, %26 : vector<2x2xf32>
    %28 = vector.extract_strided_slice %5 {offsets = [0, 0, 96], sizes = [2, 2, 32], strides = [1, 1, 1]} : vector<2x2x128xf32> to vector<2x2x32xf32>
    %cst_14 = arith.constant dense<0.000000e+00> : vector<2x2xf32>
    %29 = vector.multi_reduction <add>, %28, %cst_14 [2] : vector<2x2x32xf32> to vector<2x2xf32>
    %30 = vector.broadcast %6 : f32 to vector<2x2xf32>
    %31 = arith.addf %29, %30 : vector<2x2xf32>
    %c3 = arith.constant 3 : index
    %c0_15 = arith.constant 0 : index
    %c0_16 = arith.constant 0 : index
    %32 = vector.load %arg2[%c3, %c0_15, %c0_16] : memref<4x2x2xf32, #tpu.memory_space<vmem>>, vector<1x2x2xf32>
    %33 = vector.shape_cast %32 : vector<1x2x2xf32> to vector<2x2xf32>
    %34 = arith.addf %31, %33 : vector<2x2xf32>
    %cst_17 = arith.constant dense<0xFF800000> : vector<2xf32>
    %35 = vector.multi_reduction <maximumf>, %13, %cst_17 [1] : vector<2x2xf32> to vector<2xf32>
    %36 = vector.shape_cast %35 : vector<2xf32> to vector<2x1xf32>
    %cst_18 = arith.constant dense<0xFF800000> : vector<2xf32>
    %37 = vector.multi_reduction <maximumf>, %20, %cst_18 [1] : vector<2x2xf32> to vector<2xf32>
    %38 = vector.shape_cast %37 : vector<2xf32> to vector<2x1xf32>
    %39 = arith.maximumf %36, %38 : vector<2x1xf32>
    %cst_19 = arith.constant dense<0xFF800000> : vector<2xf32>
    %40 = vector.multi_reduction <maximumf>, %27, %cst_19 [1] : vector<2x2xf32> to vector<2xf32>
    %41 = vector.shape_cast %40 : vector<2xf32> to vector<2x1xf32>
    %42 = arith.maximumf %39, %41 : vector<2x1xf32>
    %cst_20 = arith.constant dense<0xFF800000> : vector<2xf32>
    %43 = vector.multi_reduction <maximumf>, %34, %cst_20 [1] : vector<2x2xf32> to vector<2xf32>
    %44 = vector.shape_cast %43 : vector<2xf32> to vector<2x1xf32>
    %45 = arith.maximumf %42, %44 : vector<2x1xf32>
    %46 = vector.broadcast %45 : vector<2x1xf32> to vector<2x2xf32>
    %47 = arith.subf %13, %46 : vector<2x2xf32>
    %48 = math.exp %47 : vector<2x2xf32>
    %49 = vector.broadcast %45 : vector<2x1xf32> to vector<2x2xf32>
    %50 = arith.subf %20, %49 : vector<2x2xf32>
    %51 = math.exp %50 : vector<2x2xf32>
    %52 = vector.broadcast %45 : vector<2x1xf32> to vector<2x2xf32>
    %53 = arith.subf %27, %52 : vector<2x2xf32>
    %54 = math.exp %53 : vector<2x2xf32>
    %55 = vector.broadcast %45 : vector<2x1xf32> to vector<2x2xf32>
    %56 = arith.subf %34, %55 : vector<2x2xf32>
    %57 = math.exp %56 : vector<2x2xf32>
    %cst_21 = arith.constant dense<0.000000e+00> : vector<2xf32>
    %58 = vector.multi_reduction <add>, %48, %cst_21 [1] : vector<2x2xf32> to vector<2xf32>
    %59 = vector.shape_cast %58 : vector<2xf32> to vector<2x1xf32>
    %cst_22 = arith.constant dense<0.000000e+00> : vector<2xf32>
    %60 = vector.multi_reduction <add>, %51, %cst_22 [1] : vector<2x2xf32> to vector<2xf32>
    %61 = vector.shape_cast %60 : vector<2xf32> to vector<2x1xf32>
    %62 = arith.addf %59, %61 : vector<2x1xf32>
    %cst_23 = arith.constant dense<0.000000e+00> : vector<2xf32>
    %63 = vector.multi_reduction <add>, %54, %cst_23 [1] : vector<2x2xf32> to vector<2xf32>
    %64 = vector.shape_cast %63 : vector<2xf32> to vector<2x1xf32>
    %65 = arith.addf %62, %64 : vector<2x1xf32>
    %cst_24 = arith.constant dense<0.000000e+00> : vector<2xf32>
    %66 = vector.multi_reduction <add>, %57, %cst_24 [1] : vector<2x2xf32> to vector<2xf32>
    %67 = vector.shape_cast %66 : vector<2xf32> to vector<2x1xf32>
    %68 = arith.addf %65, %67 : vector<2x1xf32>
    %69 = tpu.reciprocal %68 {approx = true} : vector<2x1xf32> -> vector<2x1xf32>
    %70 = arith.mulf %68, %69 : vector<2x1xf32>
    %cst_25 = arith.constant 2.000000e+00 : f32
    %71 = vector.broadcast %cst_25 : f32 to vector<2x1xf32>
    %72 = arith.subf %71, %70 : vector<2x1xf32>
    %73 = arith.mulf %69, %72 : vector<2x1xf32>
    %74 = vector.broadcast %73 : vector<2x1xf32> to vector<2x2xf32>
    %75 = arith.mulf %48, %74 : vector<2x2xf32>
    %c0_26 = arith.constant 0 : index
    %c0_27 = arith.constant 0 : index
    %c0_28 = arith.constant 0 : index
    %76 = vector.load %arg5[%c0_26, %c0_27, %c0_28] : memref<4x2x2xf32, #tpu.memory_space<vmem>>, vector<1x2x2xf32>
    %77 = vector.shape_cast %76 : vector<1x2x2xf32> to vector<2x2xf32>
    %78 = vector.shape_cast %75 : vector<2x2xf32> to vector<1x2x2xf32>
    tpu.vector_store %arg5[%c0_26, %c0_27, %c0_28], %78 {strides = array<i32>} : memref<4x2x2xf32, #tpu.memory_space<vmem>>, vector<1x2x2xf32>,
    %79 = vector.broadcast %73 : vector<2x1xf32> to vector<2x2xf32>
    %80 = arith.mulf %51, %79 : vector<2x2xf32>
    %c1_29 = arith.constant 1 : index
    %c0_30 = arith.constant 0 : index
    %c0_31 = arith.constant 0 : index
    %81 = vector.load %arg5[%c1_29, %c0_30, %c0_31] : memref<4x2x2xf32, #tpu.memory_space<vmem>>, vector<1x2x2xf32>
    %82 = vector.shape_cast %81 : vector<1x2x2xf32> to vector<2x2xf32>
    %83 = vector.shape_cast %80 : vector<2x2xf32> to vector<1x2x2xf32>
    tpu.vector_store %arg5[%c1_29, %c0_30, %c0_31], %83 {strides = array<i32>} : memref<4x2x2xf32, #tpu.memory_space<vmem>>, vector<1x2x2xf32>,
    %84 = vector.broadcast %73 : vector<2x1xf32> to vector<2x2xf32>
    %85 = arith.mulf %54, %84 : vector<2x2xf32>
    %c2_32 = arith.constant 2 : index
    %c0_33 = arith.constant 0 : index
    %c0_34 = arith.constant 0 : index
    %86 = vector.load %arg5[%c2_32, %c0_33, %c0_34] : memref<4x2x2xf32, #tpu.memory_space<vmem>>, vector<1x2x2xf32>
    %87 = vector.shape_cast %86 : vector<1x2x2xf32> to vector<2x2xf32>
    %88 = vector.shape_cast %85 : vector<2x2xf32> to vector<1x2x2xf32>
    tpu.vector_store %arg5[%c2_32, %c0_33, %c0_34], %88 {strides = array<i32>} : memref<4x2x2xf32, #tpu.memory_space<vmem>>, vector<1x2x2xf32>,
    %89 = vector.broadcast %73 : vector<2x1xf32> to vector<2x2xf32>
    %90 = arith.mulf %57, %89 : vector<2x2xf32>
    %c3_35 = arith.constant 3 : index
    %c0_36 = arith.constant 0 : index
    %c0_37 = arith.constant 0 : index
    %91 = vector.load %arg5[%c3_35, %c0_36, %c0_37] : memref<4x2x2xf32, #tpu.memory_space<vmem>>, vector<1x2x2xf32>
    %92 = vector.shape_cast %91 : vector<1x2x2xf32> to vector<2x2xf32>
    %93 = vector.shape_cast %90 : vector<2x2xf32> to vector<1x2x2xf32>
    tpu.vector_store %arg5[%c3_35, %c0_36, %c0_37], %93 {strides = array<i32>} : memref<4x2x2xf32, #tpu.memory_space<vmem>>, vector<1x2x2xf32>,
    return
  }
  func.func @transform_0(%arg0: i32) -> (i32, i32, i32) {
    %c0_i32 = arith.constant 0 : i32
    %c0_i32_0 = arith.constant 0 : i32
    %c0_i32_1 = arith.constant 0 : i32
    return %arg0, %c0_i32, %c0_i32_0 : i32, i32, i32
  }
  func.func @transform_1(%arg0: i32) -> (i32, i32, i32) {
    %c0_i32 = arith.constant 0 : i32
    %c0_i32_0 = arith.constant 0 : i32
    %c0_i32_1 = arith.constant 0 : i32
    return %c0_i32, %arg0, %c0_i32_0 : i32, i32, i32
  }
  func.func @transform_2(%arg0: i32) -> (i32, i32) {
    %c0_i32 = arith.constant 0 : i32
    %c0_i32_0 = arith.constant 0 : i32
    %c0_i32_1 = arith.constant 0 : i32
    return %c0_i32, %c0_i32_0 : i32, i32
  }
  func.func @transform_3(%arg0: i32) -> i32 {
    %c0_i32 = arith.constant 0 : i32
    %c0_i32_0 = arith.constant 0 : i32
    return %c0_i32 : i32
  }
  func.func @transform_4(%arg0: i32) -> (i32, i32, i32) {
    %c0_i32 = arith.constant 0 : i32
    %c0_i32_0 = arith.constant 0 : i32
    %c0_i32_1 = arith.constant 0 : i32
    return %c0_i32, %arg0, %c0_i32_0 : i32, i32, i32
  }
}

</mosaic_0001>

<bundles_post_ra>
// kernel: tpu_custom_call.1
= control target key start
LH: loop header
LB: loop body
LE: loop exit
PB: predicated region body
PF: predicated region fallthrough
CT: control target
= control target key end

     0   :  { %v42_v0 = vlaneseq  ;;  %s517_s21 = smov 64   ;;  %s518_s22 = smov 96   ;;  %vm30_vm0 = vcmask 254976   ;;  %v520_v20 = vmov 0   ;;  %vm185_vm1 = vcmask 1041409   ;;  %s680_s0 = inlined_call_operand.vmem [shape: f32[2,2,128], index: 0, kind: input, shape index: {}]   ;;  %s681_s2 = inlined_call_operand.vmem [shape: f32[1,128], index: 2, kind: input, shape index: {}]   ;;  %s682_s1 = inlined_call_operand.vmem [shape: f32[4,2,2], index: 1, kind: input, shape index: {}]   ;;  %s683_s3 = inlined_call_operand.<no memory space> [shape: f32[1], index: 3, kind: input, shape index: {}]   ;;  %s684_s4 = inlined_call_operand.vmem [shape: f32[4,2,2], index: 4, kind: output, shape index: {}]  }
   0x1   :  { %v18_v1 = vld [vmem:[%s680_s0] sm:$0x3]  ;;  %v19_v3 = vld [vmem:[%s680_s0 + $0x2] sm:$0x3]  ;;  %s519_s23 = smov 32   ;;  %498 = vset.pattern.permute.xlu1 %v520_v20  ;;  %497 = vset.pattern.permute.xlu0 %v520_v20  ;;  %v37_v39 = vstv %s683_s3  ;;  %vm188_vm2 = vcmask 9216  }
   0x2   :  { %v486_v2 = vld [vmem:[%s681_s2] ss:$0 sm:$0xff]  ;;  %v43_v5 = vshrl.u32 %v42_v0, 7  ;;  %v176_v6 = vand.u32 127, %v42_v0  ;;  %v487_v16 = vld [vmem:[%s682_s1 + $0x2] sm:$0x3] }
   0x3   :  { %v27_v4 = vmul.f32 %v486_v2, %v18_v1  ;;  %v28_v7 = vmul.f32 %v486_v2, %v19_v3  ;;  %v40_v13 = vld [vmem:[%s682_s1] sm:$0x3]  ;;  %v488_v17 = vld [vmem:[%s682_s1 + $0x4] sm:$0x3]  ;;  %v489_v35 = vld [vmem:[%s682_s1 + $0x6] sm:$0x3] }
   0x4   :  { %v555_v8 = vsub.s32 %v176_v6, %v43_v5  ;;  %v559_v11 = vsub.s32 0, %v43_v5  ;;  %v561_v12 = vsub.s32 1, %v43_v5 }
   0x5   :  { %97 = vrot.lane.b32.xlu1 %v27_v4, %s517_s21  ;;  %62 = vrot.lane.b32.xlu0 %v27_v4, %s518_s22  ;;  %v31_v9 = vsel %vm30_vm0, %v27_v4, 0.0  ;;  %v34_v10 = vsel %vm30_vm0, %v28_v7, 0.0 }
   0x6   :  { %v45_v14 = vrot.slane %v40_v13, %v559_v11  ;;  %v52_v15 = vrot.slane %v40_v13, %v561_v12  ;;  %v82_v18 = vrot.slane %v487_v16, %v559_v11  ;;  %v117_v19 = vrot.slane %v488_v17, %v559_v11 }
   0x7   :  { %v89_v21 = vrot.slane %v487_v16, %v561_v12  ;;  %v124_v22 = vrot.slane %v488_v17, %v561_v12  ;;  %v159_v36 = vrot.slane %v489_v35, %v561_v12  ;;  %v152_v37 = vrot.slane %v489_v35, %v559_v11 }
   0x9   :  { %64 = vrot.lane.b32.xlu0 %v28_v7, %s518_s22  ;;  %99 = vrot.lane.b32.xlu1 %v28_v7, %s517_s21 }
   0xd   :  { %134 = vrot.lane.b32.xlu1 %v28_v7, %s519_s23  ;;  %132 = vrot.lane.b32.xlu0 %v27_v4, %s519_s23 }
  0x2c   :  { %32 = vadd.xlane.f32.xlu0 %v31_v9 }
  0x31   :  { %35 = vadd.xlane.f32.xlu1 %v34_v10 }
  0x42   :  { %47 = vbcast.lane.b32.xlu1 %v45_v14, 256  ;;  %54 = vbcast.lane.b32.xlu0 %v52_v15, 256 }
  0x46   :  { %84 = vbcast.lane.b32.xlu1 %v82_v18, 256  ;;  %119 = vbcast.lane.b32.xlu0 %v117_v19, 256 }
  0x4a   :  { %91 = vbcast.lane.b32.xlu1 %v89_v21, 256 }
  0x4e   :  { %126 = vbcast.lane.b32.xlu1 %v124_v22, 256 }
  0x77   :  { %v98_v23 = vpop.permute.xlu1 %97  ;;  %v63_v24 = vpop.permute.xlu0 %62 }
  0x78   :  { %v103_v25 = vsel %vm30_vm0, %v98_v23, 0.0  ;;  %v68_v26 = vsel %vm30_vm0, %v63_v24, 0.0 }
  0x79   :  { %104 = vadd.xlane.f32.xlu1 %v103_v25  ;;  %69 = vadd.xlane.f32.xlu0 %v68_v26 }
  0x7b   :  { %v65_v27 = vpop.permute.xlu0 %64  ;;  %v100_v28 = vpop.permute.xlu1 %99 }
  0x7c   :  { %v71_v29 = vsel %vm30_vm0, %v65_v27, 0.0  ;;  %v106_v30 = vsel %vm30_vm0, %v100_v28, 0.0 }
  0x7d   :  { %72 = vadd.xlane.f32.xlu0 %v71_v29 }
  0x7f   :  { %v133_v31 = vpop.permute.xlu0 %132  ;;  %v135_v32 = vpop.permute.xlu1 %134 }
  0x80   :  { %v138_v33 = vsel %vm30_vm0, %v133_v31, 0.0  ;;  %v141_v34 = vsel %vm30_vm0, %v135_v32, 0.0 }
  0x81   :  { %107 = vadd.xlane.f32.xlu0 %v106_v30  ;;  %139 = vadd.xlane.f32.xlu1 %v138_v33 }
  0x85   :  { %142 = vadd.xlane.f32.xlu0 %v141_v34 }
  0x92   :  { %161 = vbcast.lane.b32.xlu1 %v159_v36, 256 }
  0x9b   :  { %154 = vbcast.lane.b32.xlu0 %v152_v37, 256 }
  0xb9   :  { %v33_v38 = vpop.xlane.xlu0 %32 }
  0xba   :  { %v38_v43 = vadd.f32 %v37_v39, %v33_v38 }
  0xbd   :  { %v55_v41 = vpop.permute.xlu0 %54 }
  0xbe   :  { %v36_v40 = vpop.xlane.xlu1 %35 }
  0xbf   :  { %v39_v42 = vadd.f32 %v37_v39, %v36_v40 }
  0xc1   :  { %v592_v44 = vadd.f32 %v55_v41, %v39_v42  ;;  %v120_v49 = vpop.permute.xlu0 %119 }
  0xc2   :  { %v48_v45 = vpop.permute.xlu1 %47 }
  0xc3   :  { %v594_v46 = vadd.f32 %v48_v45, %v38_v43  ;;  %173 = vperm.xlu1 %498, %v592_v44  }
  0xc5   :  { %170 = vperm.xlu0 %497, %v594_v46  }
  0xc6   :  { %v85_v47 = vpop.permute.xlu1 %84 }
  0xca   :  { %v92_v48 = vpop.permute.xlu1 %91 }
  0xce   :  { %v127_v50 = vpop.permute.xlu1 %126 }
 0x106   :  { %v70_v51 = vpop.xlane.xlu0 %69  ;;  %v105_v54 = vpop.xlane.xlu1 %104 }
 0x107   :  { %v74_v52 = vadd.f32 %v70_v51, %v37_v39  ;;  %v109_v57 = vadd.f32 %v105_v54, %v37_v39 }
 0x109   :  { %v598_v53 = vadd.f32 %v85_v47, %v74_v52  ;;  %v130_v60 = vadd.f32 %v120_v49, %v109_v57 }
 0x10a   :  { %v73_v55 = vpop.xlane.xlu0 %72 }
 0x10b   :  { %v75_v56 = vadd.f32 %v73_v55, %v37_v39  ;;  %195 = vperm.xlu0 %497, %v598_v53  }
 0x10d   :  { %v601_v58 = vadd.f32 %v92_v48, %v75_v56 }
 0x10e   :  { %v108_v59 = vpop.xlane.xlu0 %107  ;;  %v140_v62 = vpop.xlane.xlu1 %139 }
 0x10f   :  { %198 = vperm.xlu0 %497, %v601_v58   ;;  %v110_v61 = vadd.f32 %v108_v59, %v37_v39  ;;  %v144_v0 = vadd.f32 %v140_v62, %v37_v39 }
 0x111   :  { %v131_v1 = vadd.f32 %v127_v50, %v110_v61 }
 0x112   :  { %v143_v63 = vpop.xlane.xlu0 %142  ;;  %v162_v5 = vpop.permute.xlu1 %161 }
 0x113   :  { %217 = vperm.xlu0 %497, %v130_v60   ;;  %v145_v4 = vadd.f32 %v143_v63, %v37_v39 }
 0x115   :  { %v166_v6 = vadd.f32 %v162_v5, %v145_v4 }
 0x116   :  { %v155_v2 = vpop.permute.xlu0 %154 }
 0x117   :  { %220 = vperm.xlu0 %497, %v131_v1   ;;  %v604_v3 = vadd.f32 %v155_v2, %v144_v0 }
 0x11b   :  { %239 = vperm.xlu0 %497, %v604_v3  }
 0x11f   :  { %242 = vperm.xlu0 %497, %v166_v6  }
 0x142   :  { %v174_v7 = vpop.permute.xlu1 %173 }
 0x143   :  { %v184_v9 = vrot.slane %v174_v7, %v555_v8 }
 0x144   :  { %v171_v10 = vpop.permute.xlu0 %170 }
 0x145   :  { %v180_v13 = vrot.slane %v171_v10, %v555_v8 }
 0x147   :  { %v186_v14 = vsel %vm185_vm1, %v184_v9, %v180_v13 }
 0x148   :  { %v189_v15 = vsel %vm188_vm2, %v186_v14, -inf }
 0x149   :  { %190 = vmax.xlane.f32.xlu1 %v189_v15 }
 0x18a   :  { %v196_v16 = vpop.permute.xlu0 %195 }
 0x18b   :  { %v203_v18 = vrot.slane %v196_v16, %v555_v8 }
 0x18e   :  { %v199_v17 = vpop.permute.xlu0 %198 }
 0x18f   :  { %v207_v19 = vrot.slane %v199_v17, %v555_v8 }
 0x191   :  { %v208_v20 = vsel %vm185_vm1, %v207_v19, %v203_v18 }
 0x192   :  { %v218_v21 = vpop.permute.xlu0 %217  ;;  %v210_v22 = vsel %vm188_vm2, %v208_v20, -inf }
 0x193   :  { %211 = vmax.xlane.f32.xlu0 %v210_v22  ;;  %v225_v24 = vrot.slane %v218_v21, %v555_v8 }
 0x196   :  { %v221_v23 = vpop.permute.xlu0 %220 }
 0x197   :  { %v229_v25 = vrot.slane %v221_v23, %v555_v8 }
 0x199   :  { %v230_v26 = vsel %vm185_vm1, %v229_v25, %v225_v24 }
 0x19a   :  { %v240_v27 = vpop.permute.xlu0 %239  ;;  %v232_v28 = vsel %vm188_vm2, %v230_v26, -inf }
 0x19b   :  { %233 = vmax.xlane.f32.xlu1 %v232_v28  ;;  %v247_v30 = vrot.slane %v240_v27, %v555_v8 }
 0x19e   :  { %v243_v29 = vpop.permute.xlu0 %242 }
 0x19f   :  { %v251_v31 = vrot.slane %v243_v29, %v555_v8 }
 0x1a1   :  { %v252_v32 = vsel %vm185_vm1, %v251_v31, %v247_v30 }
 0x1a2   :  { %v254_v33 = vsel %vm188_vm2, %v252_v32, -inf }
 0x1a3   :  { %255 = vmax.xlane.f32.xlu1 %v254_v33 }
 0x1d6   :  { %v191_v34 = vpop.xlane.xlu1 %190 }
 0x220   :  { %v212_v35 = vpop.xlane.xlu0 %211 }
 0x221   :  { %v213_v37 = vmax.f32 %v191_v34, %v212_v35 }
 0x228   :  { %v234_v36 = vpop.xlane.xlu1 %233 }
 0x229   :  { %v235_v38 = vmax.f32 %v213_v37, %v234_v36 }
 0x230   :  { %v256_v39 = vpop.xlane.xlu1 %255 }
 0x231   :  { %v257_v40 = vmax.f32 %v235_v38, %v256_v39 }
 0x233   :  { %v262_v41 = vrot.slane %v257_v40, %v559_v11  ;;  %v266_v42 = vrot.slane %v257_v40, %v561_v12 }
 0x235   :  { %v269_v43 = vsub.f32 %v594_v46, %v262_v41  ;;  %v270_v45 = vsub.f32 %v592_v44, %v266_v42  ;;  %v275_v47 = vsub.f32 %v598_v53, %v262_v41  ;;  %v281_v48 = vsub.f32 %v130_v60, %v262_v41 }
 0x236   :  { %v282_v51 = vsub.f32 %v131_v1, %v266_v42  ;;  %v276_v54 = vsub.f32 %v601_v58, %v266_v42  ;;  %v287_v57 = vsub.f32 %v604_v3, %v262_v41  ;;  %v288_v59 = vsub.f32 %v166_v6, %v266_v42 }
 0x237   :  { %v271_v49 = vmul.f32 1.442695, %v269_v43  ;;  %v273_v50 = vmul.f32 1.442695, %v270_v45  ;;  %v283_v52 = vmul.f32 1.442695, %v281_v48 }
 0x238   :  { %v277_v55 = vmul.f32 1.442695, %v275_v47  ;;  %v285_v56 = vmul.f32 1.442695, %v282_v51  ;;  %v279_v46 = vmul.f32 1.442695, %v276_v54 }
 0x239   :  { %499 = vpow2.f32 %v271_v49  ;;  %v289_v44 = vmul.f32 1.442695, %v287_v57  ;;  %v291_v53 = vmul.f32 1.442695, %v288_v59 }
 0x23a   :  { %501 = vpow2.f32 %v273_v50 }
 0x23b   :  { %503 = vpow2.f32 %v283_v52 }
 0x23c   :  { %505 = vpow2.f32 %v277_v55 }
 0x23d   :  { %507 = vpow2.f32 %v285_v56 }
 0x23e   :  { %509 = vpow2.f32 %v279_v46 }
 0x23f   :  { %511 = vpow2.f32 %v289_v44 }
 0x240   :  { %513 = vpow2.f32 %v291_v53 }
 0x243   :  { %v500_v60 = vpop.eup %499 }
 0x244   :  { %v502_v61 = vpop.eup %501  ;;  %296 = vperm.xlu1 %498, %v500_v60  }
 0x245   :  { %299 = vperm.xlu0 %497, %v502_v61   ;;  %v630_v62 = vpop.eup %503 }
 0x246   :  { %v506_v58 = vpop.eup %505 }
 0x247   :  { %v508_v63 = vpop.eup %507 }
 0x248   :  { %339 = vperm.xlu1 %498, %v630_v62   ;;  %v510_v0 = vpop.eup %509 }
 0x249   :  { %317 = vperm.xlu0 %497, %v506_v58   ;;  %v512_v1 = vpop.eup %511 }
 0x24a   :  { %v514_v2 = vpop.eup %513 }
 0x24c   :  { %342 = vperm.xlu1 %498, %v508_v63  }
 0x24d   :  { %320 = vperm.xlu0 %497, %v510_v0  }
 0x250   :  { %361 = vperm.xlu1 %498, %v512_v1  }
 0x251   :  { %364 = vperm.xlu0 %497, %v514_v2  }
 0x2c3   :  { %v297_v3 = vpop.permute.xlu1 %296 }
 0x2c4   :  { %v300_v4 = vpop.permute.xlu0 %299  ;;  %v304_v5 = vrot.slane %v297_v3, %v555_v8 }
 0x2c5   :  { %v308_v6 = vrot.slane %v300_v4, %v555_v8 }
 0x2c7   :  { %v340_v7 = vpop.permute.xlu1 %339  ;;  %v309_v9 = vsel %vm185_vm1, %v308_v6, %v304_v5 }
 0x2c8   :  { %v318_v10 = vpop.permute.xlu0 %317  ;;  %v311_v13 = vsel %vm188_vm2, %v309_v9, 0.0  ;;  %v347_v15 = vrot.slane %v340_v7, %v555_v8 }
 0x2c9   :  { %312 = vadd.xlane.f32.xlu1 %v311_v13  ;;  %v325_v18 = vrot.slane %v318_v10, %v555_v8 }
 0x2cb   :  { %v343_v14 = vpop.permute.xlu1 %342 }
 0x2cc   :  { %v321_v16 = vpop.permute.xlu0 %320  ;;  %v351_v17 = vrot.slane %v343_v14, %v555_v8 }
 0x2cd   :  { %v329_v19 = vrot.slane %v321_v16, %v555_v8 }
 0x2ce   :  { %v352_v20 = vsel %vm185_vm1, %v351_v17, %v347_v15 }
 0x2cf   :  { %v362_v21 = vpop.permute.xlu1 %361  ;;  %v330_v22 = vsel %vm185_vm1, %v329_v19, %v325_v18  ;;  %v354_v23 = vsel %vm188_vm2, %v352_v20, 0.0 }
 0x2d0   :  { %v365_v24 = vpop.permute.xlu0 %364  ;;  %v369_v25 = vrot.slane %v362_v21, %v555_v8  ;;  %v332_v26 = vsel %vm188_vm2, %v330_v22, 0.0  ;;  %355 = vadd.xlane.f32.xlu1 %v354_v23 }
 0x2d1   :  { %v373_v27 = vrot.slane %v365_v24, %v555_v8  ;;  %333 = vadd.xlane.f32.xlu0 %v332_v26 }
 0x2d3   :  { %v374_v28 = vsel %vm185_vm1, %v373_v27, %v369_v25 }
 0x2d4   :  { %v376_v29 = vsel %vm188_vm2, %v374_v28, 0.0 }
 0x2d5   :  { %377 = vadd.xlane.f32.xlu0 %v376_v29 }
 0x356   :  { %v313_v30 = vpop.xlane.xlu1 %312 }
 0x35d   :  { %v356_v33 = vpop.xlane.xlu1 %355 }
 0x35e   :  { %v334_v31 = vpop.xlane.xlu0 %333 }
 0x35f   :  { %v335_v32 = vadd.f32 %v334_v31, %v313_v30 }
 0x361   :  { %v357_v34 = vadd.f32 %v356_v33, %v335_v32 }
 0x362   :  { %v378_v35 = vpop.xlane.xlu0 %377 }
 0x363   :  { %v379_v36 = vadd.f32 %v378_v35, %v357_v34 }
 0x365   :  { %515 = vrcp.f32 %v379_v36 }
 0x36f   :  { %v516_v37 = vpop.eup %515 }
 0x370   :  { %v381_v38 = vmul.f32 %v516_v37, %v379_v36 }
 0x372   :  { %v382_v39 = vsub.f32 2.0, %v381_v38 }
 0x374   :  { %v383_v40 = vmul.f32 %v516_v37, %v382_v39 }
 0x376   :  { %v388_v41 = vrot.slane %v383_v40, %v559_v11  ;;  %v392_v42 = vrot.slane %v383_v40, %v561_v12 }
 0x378   :  { %v396_v43 = vmul.f32 %v502_v61, %v392_v42  ;;  %v395_v45 = vmul.f32 %v500_v60, %v388_v41  ;;  %v461_v47 = vmul.f32 %v514_v2, %v392_v42  ;;  %v416_v48 = vmul.f32 %v506_v58, %v388_v41 }
 0x379   :  { %v417_v49 = vmul.f32 %v510_v0, %v392_v42  ;;  %v438_v50 = vmul.f32 %v630_v62, %v388_v41  ;;  %v439_v51 = vmul.f32 %v508_v63, %v392_v42  ;;  %v460_v52 = vmul.f32 %v512_v1, %v388_v41 }
 0x37a   :  { %403 = vperm.xlu0 %497, %v396_v43   ;;  %400 = vperm.xlu1 %498, %v395_v45  }
 0x37e   :  { %468 = vperm.xlu0 %497, %v461_v47   ;;  %421 = vperm.xlu1 %498, %v416_v48  }
 0x382   :  { %424 = vperm.xlu1 %498, %v417_v49  }
 0x386   :  { %443 = vperm.xlu1 %498, %v438_v50  }
 0x38a   :  { %446 = vperm.xlu1 %498, %v439_v51  }
 0x38e   :  { %465 = vperm.xlu1 %498, %v460_v52  }
 0x3f9   :  { %v404_v11 = vpop.permute.xlu0 %403  ;;  %v401_v54 = vpop.permute.xlu1 %400 }
 0x3fa   :  { %v412_v12 = vrot.slane %v404_v11, %v555_v8  ;;  %v408_v55 = vrot.slane %v401_v54, %v555_v8 }
 0x3fc   :  { %v413_v56 = vsel %vm185_vm1, %v412_v12, %v408_v55 }
 0x3fd   :  { %415 = vst.msk [vmem:[%s684_s4] sm:$0x3] %vm188_vm2, %v413_v56  ;;  %v422_v57 = vpop.permute.xlu1 %421  ;;  %v469_v63 = vpop.permute.xlu0 %468 }
 0x3fe   :  { %v429_v59 = vrot.slane %v422_v57, %v555_v8  ;;  %v477_v2 = vrot.slane %v469_v63, %v555_v8 }
 0x401   :  { %v425_v46 = vpop.permute.xlu1 %424 }
 0x402   :  { %v433_v44 = vrot.slane %v425_v46, %v555_v8 }
 0x404   :  { %v434_v53 = vsel %vm185_vm1, %v433_v44, %v429_v59 }
 0x405   :  { %490 = vst.msk [vmem:[%s684_s4 + $0x2] sm:$0x3] %vm188_vm2, %v434_v53  ;;  %v444_v60 = vpop.permute.xlu1 %443 }
 0x406   :  { %v451_v62 = vrot.slane %v444_v60, %v555_v8 }
 0x409   :  { %v447_v61 = vpop.permute.xlu1 %446 }
 0x40a   :  { %v455_v58 = vrot.slane %v447_v61, %v555_v8 }
 0x40c   :  { %v456_v0 = vsel %vm185_vm1, %v455_v58, %v451_v62 }
 0x40d   :  { %491 = vst.msk [vmem:[%s684_s4 + $0x4] sm:$0x3] %vm188_vm2, %v456_v0  ;;  %v466_v1 = vpop.permute.xlu1 %465 }
 0x40e   :  { %v473_v3 = vrot.slane %v466_v1, %v555_v8 }
 0x410   :  { %v478_v4 = vsel %vm185_vm1, %v477_v2, %v473_v3 }
 0x411   :  { %492 = vst.msk [vmem:[%s684_s4 + $0x6] sm:$0x3] %vm188_vm2, %v478_v4 }

</bundles_post_ra>
